<compile_context>
chip_gen: v5e
topology: v5e:2x2
jax: 0.10.0
libtpu: 0.0.40
codegen_flags: <defaults>
</compile_context>

<pallas_src>
import functools
import math

import jax
import jax.numpy as jnp
from jax.experimental import pallas as pl
from jax.experimental.pallas import tpu as pltpu


def _round_up(x, m):
    return ((x + m - 1) // m) * m


def _linear_wn_kernel(x_ref, w_ref, s_ref, b_ref, o_ref, acc_ref, *, activations):
    # x_ref: (tm, tk)   input dtype
    # w_ref: (tk, tn)   input dtype (v pre-transposed to (K, N) in the wrapper)
    # s_ref: (1, tn)    f32 column scale = g / ||v_row||
    # b_ref: (1, tn)    f32 bias
    # o_ref: (tm, tn)   output (x.dtype)
    # acc_ref: (tm, tn) f32 accumulator scratch, resident across the K grid axis
    k = pl.program_id(2)

    @pl.when(k == 0)
    def _():
        acc_ref[...] = jnp.zeros_like(acc_ref)

    # Plain NN matmul: K contracted on axis 1 of x and axis 0 of w, native dtype
    # operands, f32 accumulation on the MXU.  No in-kernel transpose.
    acc_ref[...] += jnp.dot(x_ref[...], w_ref[...], preferred_element_type=jnp.float32)

    @pl.when(k == pl.num_programs(2) - 1)
    def _():
        y = acc_ref[...] * s_ref[...] + b_ref[...]
        if activations:
            # GeLU (tanh approximation) exactly as written in the PyTorch module
            y = 0.5 * y * (1.0 + jnp.tanh(y * 0.7978845608 * (1.0 + 0.044715 * y * y)))
        o_ref[...] = y.astype(o_ref.dtype)


def prepare_weightnorm(v, g, bias):
    """One-time weight-side prep.  Hoist out of the per-call path when weights are reused.

    v: (N, K) PyTorch nn.Linear weight layout, g: (N, 1) or (N,), bias: (N,).
    Returns (wt, scale, bias32): wt = v.T in native dtype (K, N),
    scale = g / ||v_row|| in f32, bias32 in f32.
    (Zero rows of v give inf/NaN scale — same as PyTorch weight_norm.)
    """
    N, K = v.shape
    v32 = v.astype(jnp.float32)
    norm = jnp.sqrt(jnp.sum(v32 * v32, axis=-1))                  # (N,)
    scale = g.reshape(N).astype(jnp.float32) / norm               # (N,)
    return v.T, scale, bias.reshape(N).astype(jnp.float32)


def linear_weightnorm_prepared(x, wt, scale, bias32, *, activations=False,
                               tm=256, tn=512, tk=1024):
    """y = x @ (scale * wt) + bias  [+ GeLU], wt already (K, N)."""
    M, K = x.shape
    K2, N = wt.shape
    assert K == K2

    # Clamp tiles to the (padded) problem size; respect (8, 128) tiling constraints.
    tm = min(tm, _round_up(M, 8))
    tn = min(tn, _round_up(N, 128))
    tk = min(tk, _round_up(K, 128))

    # v7x megacore: if there is only one M block, shrink tn (multiples of 128) so the
    # parallel N axis has >= 2 blocks for the two TensorCores to share.
    if _round_up(M, tm) // tm == 1:
        while tn > 128 and _round_up(N, tn) // tn < 2:
            tn = max(128, ((tn // 2) // 128) * 128)

    Mp, Np, Kp = _round_up(M, tm), _round_up(N, tn), _round_up(K, tk)

    xp = x if (Mp == M and Kp == K) else jnp.pad(x, ((0, Mp - M), (0, Kp - K)))
    wp = wt if (Np == N and Kp == K) else jnp.pad(wt, ((0, Kp - K), (0, Np - N)))
    sp = (scale if Np == N else jnp.pad(scale, (0, Np - N))).reshape(1, Np)
    bp = (bias32 if Np == N else jnp.pad(bias32, (0, Np - N))).reshape(1, Np)

    grid = (Mp // tm, Np // tn, Kp // tk)
    kernel = functools.partial(_linear_wn_kernel, activations=activations)

    out = pl.pallas_call(
        kernel,
        out_shape=jax.ShapeDtypeStruct((Mp, Np), x.dtype),
        grid_spec=pltpu.PrefetchScalarGridSpec(
            num_scalar_prefetch=0,
            grid=grid,
            in_specs=[
                pl.BlockSpec((tm, tk), lambda i, j, k: (i, k)),   # x tile
                pl.BlockSpec((tk, tn), lambda i, j, k: (k, j)),   # weight tile (KN layout)
                pl.BlockSpec((1, tn), lambda i, j, k: (0, j)),    # scale, lane-dense
                pl.BlockSpec((1, tn), lambda i, j, k: (0, j)),    # bias,  lane-dense
            ],
            out_specs=pl.BlockSpec((tm, tn), lambda i, j, k: (i, j)),
            scratch_shapes=[pltpu.VMEM((tm, tn), jnp.float32)],
        ),
        compiler_params=pltpu.CompilerParams(
            # M / N are independent (megacore-parallel); K is the reduction, kept last
            # and marked arbitrary (resident accumulator pattern).
            dimension_semantics=("parallel", "parallel", "arbitrary"),
            # Tile footprint here is well under this; cap keeps headroom on v7x (64 MiB).
            vmem_limit_bytes=48 * 1024 * 1024,
        ),
    )(xp, wp, sp, bp)

    if Mp != M or Np != N:
        out = out[:M, :N]
    return out


def linear_weightnorm(x, v, g, bias, *, activations=False, **tile_kwargs):
    """weight_norm(nn.Linear) forward from PyTorch-layout params (v: (N, K))."""
    wt, scale, b32 = prepare_weightnorm(v, g, bias)
    return linear_weightnorm_prepared(x, wt, scale, b32,
                                      activations=activations, **tile_kwargs)


def init_linear_params(key, in_features, out_features, activations=False):
    # Mirrors the PyTorch __init__:
    #   nn.init.normal_(weight, std=sqrt((2 if activations else 1)/in_features))
    #   nn.init.zeros_(bias)
    #   weight_norm(dim=0) -> g initialized to per-row L2 norm of the initial weight
    std = math.sqrt((2.0 if activations else 1.0) / in_features)
    v = std * jax.random.normal(key, (out_features, in_features), dtype=jnp.float32)
    g = jnp.sqrt(jnp.sum(v * v, axis=-1, keepdims=True))          # (N, 1)
    bias = jnp.zeros((out_features,), dtype=jnp.float32)
    return v, g, bias


def _reference_forward(x, v, g, bias, activations):
    x32 = x.astype(jnp.float32)
    v32 = v.astype(jnp.float32)
    w = v32 * (g.astype(jnp.float32) / jnp.sqrt(jnp.sum(v32 * v32, -1, keepdims=True)))
    y = x32 @ w.T + bias.astype(jnp.float32)
    if activations:
        y = 0.5 * y * (1.0 + jnp.tanh(y * 0.7978845608 * (1.0 + 0.044715 * y * y)))
    return y


if __name__ == "__main__":
    key = jax.random.PRNGKey(0)
    k1, k2, k3, k4, k5, k6 = jax.random.split(key, 6)

    # --- Test 1: small shapes implied by the module (batch=8, in=32, out=64), GeLU on ---
    M, IN, OUT = 8, 32, 64
    x = jax.random.normal(k1, (M, IN), dtype=jnp.float32)
    v, g, bias = init_linear_params(k2, IN, OUT, activations=True)
    out = jax.block_until_ready(linear_weightnorm(x, v, g, bias, activations=True))
    y_ref = _reference_forward(x, v, g, bias, True)
    assert out.shape == (M, OUT)
    assert jnp.allclose(out, y_ref, atol=5e-2, rtol=5e-2)

    # --- Test 2: f32, non-tile-aligned shapes (exercises padding), no GeLU ---
    M2, IN2, OUT2 = 48, 200, 72
    x2 = jax.random.normal(k3, (M2, IN2), dtype=jnp.float32)
    v2, g2, b2 = init_linear_params(k4, IN2, OUT2, activations=False)
    out2 = jax.block_until_ready(linear_weightnorm(x2, v2, g2, b2, activations=False))
    y_ref2 = _reference_forward(x2, v2, g2, b2, False)
    assert out2.shape == (M2, OUT2)
    assert jnp.allclose(out2, y_ref2, atol=5e-2, rtol=5e-2)

    # --- Test 3: bf16 operands, multi-tile N / K grid (MXU path), GeLU on ---
    M3, IN3, OUT3 = 256, 512, 384
    x3 = jax.random.normal(k5, (M3, IN3), dtype=jnp.float32).astype(jnp.bfloat16)
    v3, g3, b3 = init_linear_params(k6, IN3, OUT3, activations=True)
    v3_bf16 = v3.astype(jnp.bfloat16)
    out3 = jax.block_until_ready(
        linear_weightnorm(x3, v3_bf16, g3, b3, activations=True))
    y_ref3 = _reference_forward(x3, v3_bf16, g3, b3, True)
    assert out3.shape == (M3, OUT3)
    assert jnp.allclose(out3.astype(jnp.float32), y_ref3, atol=5e-2, rtol=5e-2)

    print("KERNEL_OK")
</pallas_src>

<mosaic_0001>
module attributes {stable_mosaic.version = 11 : i64} {
  func.func @_linear_wn_kernel(%arg0: i32, %arg1: i32, %arg2: i32, %arg3: memref<8x128xf32, #tpu.memory_space<vmem>>, %arg4: memref<128x128xf32, #tpu.memory_space<vmem>>, %arg5: memref<1x128xf32, #tpu.memory_space<vmem>>, %arg6: memref<1x128xf32, #tpu.memory_space<vmem>>, %arg7: memref<8x128xf32, #tpu.memory_space<vmem>>, %arg8: memref<8x128xf32, #tpu.memory_space<vmem>>) attributes {dimension_semantics = [#tpu.dimension_semantics<parallel>, #tpu.dimension_semantics<parallel>, #tpu.dimension_semantics<arbitrary>], iteration_bounds = array<i64: 1, 1, 1>, scalar_prefetch = 0 : i64, scratch_operands = 1 : i64, tpu.core_type = #tpu.core_type<tc>, window_params = [{transform_indices = @transform_0, window_bounds = array<i64: 8, 128>}, {transform_indices = @transform_1, window_bounds = array<i64: 128, 128>}, {transform_indices = @transform_2, window_bounds = array<i64: 1, 128>}, {transform_indices = @transform_3, window_bounds = array<i64: 1, 128>}, {transform_indices = @transform_4, window_bounds = array<i64: 8, 128>}]} {
    %c0_i32 = arith.constant 0 : i32
    %0 = arith.cmpi eq, %arg2, %c0_i32 : i32
    %1 = arith.extui %0 : i1 to i32
    %c0_i32_0 = arith.constant 0 : i32
    %2 = arith.cmpi ne, %1, %c0_i32_0 : i32
    scf.if %2 {
      %cst_10 = arith.constant 0.000000e+00 : f32
      %12 = vector.broadcast %cst_10 : f32 to vector<8x128xf32>
      %c0_11 = arith.constant 0 : index
      %c0_12 = arith.constant 0 : index
      %13 = vector.load %arg8[%c0_11, %c0_12] : memref<8x128xf32, #tpu.memory_space<vmem>>, vector<8x128xf32>
      tpu.vector_store %arg8[%c0_11, %c0_12], %12 {strides = array<i32>} : memref<8x128xf32, #tpu.memory_space<vmem>>, vector<8x128xf32>,
    } else {
    }
    %c0 = arith.constant 0 : index
    %c0_1 = arith.constant 0 : index
    %3 = vector.load %arg8[%c0, %c0_1] : memref<8x128xf32, #tpu.memory_space<vmem>>, vector<8x128xf32>
    %c0_2 = arith.constant 0 : index
    %c0_3 = arith.constant 0 : index
    %4 = vector.load %arg3[%c0_2, %c0_3] : memref<8x128xf32, #tpu.memory_space<vmem>>, vector<8x128xf32>
    %c0_4 = arith.constant 0 : index
    %c0_5 = arith.constant 0 : index
    %5 = vector.load %arg4[%c0_4, %c0_5] : memref<128x128xf32, #tpu.memory_space<vmem>>, vector<128x128xf32>
    %cst = arith.constant dense<0.000000e+00> : vector<8x128xf32>
    %6 = tpu.matmul %4, %5, %cst {dimension_numbers = #tpu.dot_dimension_numbers<[1], [0], [0], [1], [0, 0, 1, 1], [], []>} : vector<8x128xf32>, vector<128x128xf32>, vector<8x128xf32> -> vector<8x128xf32>
    %7 = arith.addf %3, %6 : vector<8x128xf32>
    %c0_6 = arith.constant 0 : index
    %c0_7 = arith.constant 0 : index
    %8 = vector.load %arg8[%c0_6, %c0_7] : memref<8x128xf32, #tpu.memory_space<vmem>>, vector<8x128xf32>
    tpu.vector_store %arg8[%c0_6, %c0_7], %7 {strides = array<i32>} : memref<8x128xf32, #tpu.memory_space<vmem>>, vector<8x128xf32>,
    %c0_i32_8 = arith.constant 0 : i32
    %9 = arith.cmpi eq, %arg2, %c0_i32_8 : i32
    %10 = arith.extui %9 : i1 to i32
    %c0_i32_9 = arith.constant 0 : i32
    %11 = arith.cmpi ne, %10, %c0_i32_9 : i32
    scf.if %11 {
      %c0_10 = arith.constant 0 : index
      %c0_11 = arith.constant 0 : index
      %12 = vector.load %arg8[%c0_10, %c0_11] : memref<8x128xf32, #tpu.memory_space<vmem>>, vector<8x128xf32>
      %c0_12 = arith.constant 0 : index
      %c0_13 = arith.constant 0 : index
      %13 = vector.load %arg5[%c0_12, %c0_13] : memref<1x128xf32, #tpu.memory_space<vmem>>, vector<1x128xf32>
      %14 = vector.broadcast %13 : vector<1x128xf32> to vector<8x128xf32>
      %15 = arith.mulf %12, %14 : vector<8x128xf32>
      %c0_14 = arith.constant 0 : index
      %c0_15 = arith.constant 0 : index
      %16 = vector.load %arg6[%c0_14, %c0_15] : memref<1x128xf32, #tpu.memory_space<vmem>>, vector<1x128xf32>
      %17 = vector.broadcast %16 : vector<1x128xf32> to vector<8x128xf32>
      %18 = arith.addf %15, %17 : vector<8x128xf32>
      %cst_16 = arith.constant 5.000000e-01 : f32
      %19 = vector.broadcast %cst_16 : f32 to vector<8x128xf32>
      %20 = arith.mulf %19, %18 : vector<8x128xf32>
      %cst_17 = arith.constant 0.797884583 : f32
      %21 = vector.broadcast %cst_17 : f32 to vector<8x128xf32>
      %22 = arith.mulf %18, %21 : vector<8x128xf32>
      %cst_18 = arith.constant 4.471500e-02 : f32
      %23 = vector.broadcast %cst_18 : f32 to vector<8x128xf32>
      %24 = arith.mulf %23, %18 : vector<8x128xf32>
      %25 = arith.mulf %24, %18 : vector<8x128xf32>
      %cst_19 = arith.constant 1.000000e+00 : f32
      %26 = vector.broadcast %cst_19 : f32 to vector<8x128xf32>
      %27 = arith.addf %26, %25 : vector<8x128xf32>
      %28 = arith.mulf %22, %27 : vector<8x128xf32>
      %29 = math.tanh %28 : vector<8x128xf32>
      %cst_20 = arith.constant 1.000000e+00 : f32
      %30 = vector.broadcast %cst_20 : f32 to vector<8x128xf32>
      %31 = arith.addf %30, %29 : vector<8x128xf32>
      %32 = arith.mulf %20, %31 : vector<8x128xf32>
      %c0_21 = arith.constant 0 : index
      %c0_22 = arith.constant 0 : index
      %33 = vector.load %arg7[%c0_21, %c0_22] : memref<8x128xf32, #tpu.memory_space<vmem>>, vector<8x128xf32>
      tpu.vector_store %arg7[%c0_21, %c0_22], %32 {strides = array<i32>} : memref<8x128xf32, #tpu.memory_space<vmem>>, vector<8x128xf32>,
    } else {
    }
    return
  }
  func.func @transform_0(%arg0: i32, %arg1: i32, %arg2: i32) -> (i32, i32) {
    %c0_i32 = arith.constant 0 : i32
    return %arg0, %arg2 : i32, i32
  }
  func.func @transform_1(%arg0: i32, %arg1: i32, %arg2: i32) -> (i32, i32) {
    %c0_i32 = arith.constant 0 : i32
    return %arg2, %arg1 : i32, i32
  }
  func.func @transform_2(%arg0: i32, %arg1: i32, %arg2: i32) -> (i32, i32) {
    %c0_i32 = arith.constant 0 : i32
    %c0_i32_0 = arith.constant 0 : i32
    return %c0_i32, %arg1 : i32, i32
  }
  func.func @transform_3(%arg0: i32, %arg1: i32, %arg2: i32) -> (i32, i32) {
    %c0_i32 = arith.constant 0 : i32
    %c0_i32_0 = arith.constant 0 : i32
    return %c0_i32, %arg1 : i32, i32
  }
  func.func @transform_4(%arg0: i32, %arg1: i32, %arg2: i32) -> (i32, i32) {
    %c0_i32 = arith.constant 0 : i32
    return %arg0, %arg1 : i32, i32
  }
}

</mosaic_0001>

<bundles_post_ra>
// kernel: tpu_custom_call.1
= control target key start
LH: loop header
LB: loop body
LE: loop exit
PB: predicated region body
PF: predicated region fallthrough
CT: control target
= control target key end

     0   :  { %9 = vsyncpa [#allocation4], 0  ;;  %s267_s0 = inlined_call_operand.hbm [shape: f32[8,128], index: 0, kind: input, shape index: {}]   ;;  %s268_s1 = inlined_call_operand.hbm [shape: f32[128,128], index: 1, kind: input, shape index: {}]   ;;  %s269_s2 = inlined_call_operand.vmem [shape: f32[1,128], index: 2, kind: input, shape index: {}]   ;;  %s270_s3 = inlined_call_operand.vmem [shape: f32[1,128], index: 3, kind: input, shape index: {}]   ;;  %s271_s4 = inlined_call_operand.hbm [shape: f32[8,128], index: 4, kind: output, shape index: {}]  }
   0x1   :  { %10 = vsyncpa [#allocation7], 0 }
   0x2   :  { %11 = vsyncpa [#allocation5], 0  ;;  %s17_s17 = sshll.u32 %s267_s0, 4  ;;  %s222_s18 = smov [#allocation3]   ;;  %s18_s17 = int_to_ptr.hbm [resolvable:$true] %s17_s17 }
   0x3   :  { %s19_s19 = sshll.u32 %s222_s18, 4  ;;  %s27_s22 = sshll.u32 %s268_s1, 4  ;;  %s20_s19 = int_to_ptr.vmem [resolvable:$true] %s19_s19  ;;  %s28_s22 = int_to_ptr.hbm [resolvable:$true] %s27_s22 }
   0x4   :  { %22 = dma.hbm_to_vmem [thread:$0]  %s18_s17, 128, %s20_s19, [#allocation4]  }
   0x5   :  { %s223_s23 = smov [#allocation6]   ;;  %s224_s25 = smov 128  }
   0x6   :  { %s29_s24 = sshll.u32 %s223_s23, 4  ;;  %s225_s26 = smov 8   ;;  %s30_s24 = int_to_ptr.vmem [resolvable:$true] %s29_s24 }
   0x7   :  { %35 = dma.hbm_to_vmem [thread:$0]  %s28_s22, 2048, %s30_s24, [#allocation7], %s224_s25, %s224_s25, %s225_s26  }
   0x8   :  { %216 = dma.done.wait [#allocation4], 128  }
   0x9   :  { %217 = vsyncadd [#allocation4], 4294967168 }
   0xa   :  { %218 = dma.done.wait [#allocation7], 2048  }
   0xb   :  { %219 = vsyncadd [#allocation7], 4294965248  ;;  %v70_v0 = vld [vmem:[#allocation6 + $0x78] sm:$0xff]  ;;  %v69_v1 = vld [vmem:[#allocation6 + $0x70] sm:$0xff]  ;;  %s226_s29 = smov [#allocation8]  }
   0xc   :  { %71 = vmatpush.msra.mxu0 %v70_v0  ;;  %v68_v2 = vld [vmem:[#allocation6 + $0x68] sm:$0xff]  ;;  %v67_v3 = vld [vmem:[#allocation6 + $0x60] sm:$0xff]  ;;  %v66_v4 = vld [vmem:[#allocation6 + $0x58] sm:$0xff]  ;;  %s122_s30 = sshll.u32 %s226_s29, 4  ;;  %s123_s30 = int_to_ptr.vmem [resolvable:$true] %s122_s30 }
   0xd   :  { %v65_v5 = vld [vmem:[#allocation6 + $0x50] sm:$0xff]  ;;  %v64_v6 = vld [vmem:[#allocation6 + $0x48] sm:$0xff]  ;;  %v63_v7 = vld [vmem:[#allocation6 + $0x40] sm:$0xff] }
   0xe   :  { %72 = vmatpush.msra.mxu0 %v69_v1  ;;  %v62_v8 = vld [vmem:[#allocation6 + $0x38] sm:$0xff]  ;;  %v61_v9 = vld [vmem:[#allocation6 + $0x30] sm:$0xff]  ;;  %v60_v10 = vld [vmem:[#allocation6 + $0x28] sm:$0xff] }
   0xf   :  { %v59_v11 = vld [vmem:[#allocation6 + $0x20] sm:$0xff]  ;;  %v58_v12 = vld [vmem:[#allocation6 + $0x18] sm:$0xff]  ;;  %v57_v13 = vld [vmem:[#allocation6 + $0x10] sm:$0xff] }
  0x10   :  { %73 = vmatpush.msra.mxu0 %v68_v2  ;;  %v56_v14 = vld [vmem:[#allocation6 + $0x8] sm:$0xff]  ;;  %v55_v15 = vld [vmem:[#allocation6] sm:$0xff]  ;;  %v54_v16 = vld [vmem:[#allocation3] sm:$0xff] }
  0x11   :  { %v140_v17 = vld [vmem:[%s269_s2] ss:$0 sm:$0xff]  ;;  %s124_s2 = sshll.u32 %s271_s4, 4  ;;  %s125_s2 = int_to_ptr.hbm [resolvable:$true] %s124_s2 }
  0x12   :  { %74 = vmatpush.msra.mxu0 %v67_v3  ;;  %v141_v18 = vld [vmem:[%s270_s3] ss:$0 sm:$0xff] }
  0x14   :  { %75 = vmatpush.msra.mxu0 %v66_v4 }
  0x16   :  { %76 = vmatpush.msra.mxu0 %v65_v5 }
  0x18   :  { %77 = vmatpush.msra.mxu0 %v64_v6 }
  0x1a   :  { %78 = vmatpush.msra.mxu0 %v63_v7 }
  0x1c   :  { %79 = vmatpush.msra.mxu0 %v62_v8 }
  0x1e   :  { %80 = vmatpush.msra.mxu0 %v61_v9 }
  0x20   :  { %81 = vmatpush.msra.mxu0 %v60_v10 }
  0x22   :  { %82 = vmatpush.msra.mxu0 %v59_v11 }
  0x24   :  { %83 = vmatpush.msra.mxu0 %v58_v12 }
  0x26   :  { %84 = vmatpush.msra.mxu0 %v57_v13 }
  0x28   :  { %85 = vmatpush.msra.mxu0 %v56_v14 }
  0x2a   :  { %86 = vmatpush.msra.mxu0 %v55_v15 }
  0x2b   :  { %87 = vmatmul.f32.vlgmr.msra.gmra.mxu0 %v54_v16 }
  0xa8   :  { %v88_v19 = vpop.f32.mrf.mxu0 }
  0xa9   :  { %v101_v20 = vmul.f32 %v140_v17, %v88_v19 }
  0xab   :  { %v106_v21 = vadd.f32 %v141_v18, %v101_v20 }
  0xad   :  { %v109_v22 = vmul.f32 0.044715, %v106_v21  ;;  %v108_v24 = vmul.f32 0.7978846, %v106_v21  ;;  %v107_v28 = vmul.f32 0.5, %v106_v21 }
  0xaf   :  { %v110_v23 = vmul.f32 %v109_v22, %v106_v21 }
  0xb1   :  { %v111_v25 = vadd.f32 1.0, %v110_v23 }
  0xb3   :  { %v112_v26 = vmul.f32 %v111_v25, %v108_v24 }
  0xb5   :  { %142 = vtanh.f32 %v112_v26 }
  0xbb   :  { %v143_v27 = vpop.eup %142 }
  0xbc   :  { %v114_v29 = vadd.f32 1.0, %v143_v27 }
  0xbe   :  { %v115_v30 = vmul.f32 %v114_v29, %v107_v28 }
  0xc0   :  { %116 = vst [vmem:[#allocation8] sm:$0xff] %v115_v30 }
  0xc1   :  { %127 = dma.vmem_to_hbm [thread:$0]  %s123_s30, 128, %s125_s2, [#allocation5]  }
  0xc2   :  { %220 = dma.done.wait [#allocation5], 128  }
  0xc3   :  { %221 = vsyncadd [#allocation5], 4294967168 }
  0xc4   :  { %132 = vsyncpa [#allocation4], 1 }
  0xc5   :  { %133 = vsyncpa [#allocation7], 1 }
  0xc6   :  { %134 = vsyncpa [#allocation5], 1 }

</bundles_post_ra>
